<compile_context>
chip_gen: v7x
topology: tpu7x:2x2x1
jax: 0.10.0
libtpu: 0.0.40
codegen_flags: <defaults>
</compile_context>

<pallas_src>
import functools

import jax
import jax.numpy as jnp
from jax.experimental import pallas as pl
from jax.experimental.pallas import tpu as pltpu


# ---------------------------------------------------------------------------
# In-kernel RNG helpers (plain int32/f32 ops only -> lower on Mosaic & interpret)
# ---------------------------------------------------------------------------
def _srl(x, k):
    """Logical right shift for int32 (arithmetic shift, then mask the smeared sign bits)."""
    return (x >> k) & jnp.int32((1 << (32 - k)) - 1)


def _hash_i32(idx, seed):
    """Stateless counter-based PRNG: mixes (element index, seed) -> 32 random bits."""
    x = idx * jnp.int32(-1640531527) + seed          # golden-ratio Weyl step + seed
    x = x ^ _srl(x, 16)
    x = x * jnp.int32(0x21F0AAAD)                    # lowbias32-style finalizer
    x = x ^ _srl(x, 15)
    x = x * jnp.int32(0x735A2D97)
    x = x ^ _srl(x, 15)
    return x


def _erfinv_f32(t):
    """Single-precision erfinv approximation (Giles 2010): log/sqrt/FMA/select only."""
    w = -jnp.log((1.0 - t) * (1.0 + t))
    # central branch (w < 5)
    ws = w - 2.5
    ps = 2.81022636e-08
    for coef in (3.43273939e-07, -3.5233877e-06, -4.39150654e-06, 0.00021858087,
                 -0.00125372503, -0.00417768164, 0.246640727, 1.50140941):
        ps = coef + ps * ws
    # tail branch (w >= 5)
    wb = jnp.sqrt(w) - 3.0
    pb = -0.000200214257
    for coef in (0.000100950558, 0.00134934322, -0.00367342844, 0.00573950773,
                 -0.0076224613, 0.00943887047, 1.00167406, 2.83297682):
        pb = coef + pb * wb
    return jnp.where(w < 5.0, ps, pb) * t


def _normal_from_index(idx, seed):
    """One standard-normal sample per element from (global index, seed)."""
    bits = _hash_i32(idx, seed)
    u = (_srl(bits, 9).astype(jnp.float32) + 0.5) * (1.0 / (1 << 23))   # u in (0, 1)
    return 1.4142135623730951 * _erfinv_f32(2.0 * u - 1.0)


# ---------------------------------------------------------------------------
# Kernels
# ---------------------------------------------------------------------------
def _linear_kernel(x_ref, w_ref, b_ref, o_ref, acc_ref):
    """o = x @ w + b, tiled over (M, N, K); K is the innermost reduction axis."""
    k = pl.program_id(2)

    @pl.when(k == 0)
    def _():
        acc_ref[...] = jnp.zeros_like(acc_ref)

    acc_ref[...] += jnp.dot(x_ref[...], w_ref[...],
                            preferred_element_type=jnp.float32)

    @pl.when(k == pl.num_programs(2) - 1)
    def _():
        o_ref[...] = (acc_ref[...] + b_ref[...].astype(jnp.float32)).astype(o_ref.dtype)


def _affine_lrelu_noise_kernel(seed_ref, h_ref, a_ref, c_ref, o_ref, *,
                               n_cols, mean, std, slope, apply_lrelu, add_noise):
    """y = [leaky_relu](h * a + c) [+ N(mean, std)] -- elementwise, f32 math, I/O in h.dtype."""
    y = (h_ref[...].astype(jnp.float32) * a_ref[...].astype(jnp.float32)
         + c_ref[...].astype(jnp.float32))
    if apply_lrelu:
        y = jnp.where(y >= 0.0, y, jnp.float32(slope) * y)
    if add_noise:
        tb, tc = h_ref.shape
        row = jax.lax.broadcasted_iota(jnp.int32, (tb, tc), 0) + pl.program_id(0) * tb
        col = jax.lax.broadcasted_iota(jnp.int32, (tb, tc), 1) + pl.program_id(1) * tc
        idx = row * jnp.int32(n_cols) + col            # global element index
        z = _normal_from_index(idx, seed_ref[0])
        y = y + (jnp.float32(std) * z + jnp.float32(mean))
    o_ref[...] = y.astype(o_ref.dtype)


# ---------------------------------------------------------------------------
# Wrappers
# ---------------------------------------------------------------------------
def _matmul_tiles(M, K, N):
    if M <= 8:
        tm = M
    elif M % 8 == 0:
        tm = min(M, 128)
    else:
        tm = min((M // 8) * 8, 128)
    if N < 128:
        tn = N
    elif N % 128 == 0:
        tn = min(N, 512)
    else:
        tn = 128
    # The contraction axis must tile exactly (partial K blocks would pollute the acc).
    if K % 512 == 0:
        tk = 512
    elif K % 256 == 0:
        tk = 256
    elif K % 128 == 0:
        tk = 128
    else:
        tk = K
    return tm, tk, tn


def linear_pallas(x, w, b):
    """y = x @ w + b.  x: (M, K), w: (K, N) (== torch weight.T), b: (N,)."""
    M, K = x.shape
    K2, N = w.shape
    assert K == K2 and b.shape == (N,)
    tm, tk, tn = _matmul_tiles(M, K, N)
    grid = (pl.cdiv(M, tm), pl.cdiv(N, tn), K // tk)
    return pl.pallas_call(
        _linear_kernel,
        out_shape=jax.ShapeDtypeStruct((M, N), x.dtype),
        grid_spec=pltpu.PrefetchScalarGridSpec(
            num_scalar_prefetch=0,
            grid=grid,
            in_specs=[
                pl.BlockSpec((tm, tk), lambda i, j, k: (i, k)),
                pl.BlockSpec((tk, tn), lambda i, j, k: (k, j)),
                pl.BlockSpec((1, tn), lambda i, j, k: (0, j)),
            ],
            out_specs=pl.BlockSpec((tm, tn), lambda i, j, k: (i, j)),
            scratch_shapes=[pltpu.VMEM((tm, tn), jnp.float32)],
        ),
        compiler_params=pltpu.CompilerParams(
            dimension_semantics=("parallel", "parallel", "arbitrary")),
    )(x, w, b.reshape(1, N))


def _elementwise_tiles(R, C):
    tc = C if C <= 1024 else 1024                # lane-dense, <= 1 MiB f32 blocks
    if R <= 8:
        tb = R
    else:
        tb = min((R // 8) * 8, 256)
    return tb, tc


def fused_affine_lrelu_noise(h, a, c, seed, *, mean=0.0, std=0.2, slope=0.2,
                             apply_lrelu=True, add_noise=True):
    """Fused per-feature affine (+LeakyReLU) (+Gaussian noise) over a 2-D array."""
    R, C = h.shape
    tb, tc = _elementwise_tiles(R, C)
    grid = (pl.cdiv(R, tb), pl.cdiv(C, tc))
    seed_arr = jnp.reshape(jnp.asarray(seed, dtype=jnp.int32), (1,))
    kernel = functools.partial(
        _affine_lrelu_noise_kernel, n_cols=C, mean=float(mean), std=float(std),
        slope=float(slope), apply_lrelu=apply_lrelu, add_noise=add_noise)
    return pl.pallas_call(
        kernel,
        out_shape=jax.ShapeDtypeStruct((R, C), h.dtype),
        grid_spec=pltpu.PrefetchScalarGridSpec(
            num_scalar_prefetch=1,               # seed lands in SMEM
            grid=grid,
            in_specs=[
                pl.BlockSpec((tb, tc), lambda i, j, s: (i, j)),
                pl.BlockSpec((1, tc), lambda i, j, s: (0, j)),
                pl.BlockSpec((1, tc), lambda i, j, s: (0, j)),
            ],
            out_specs=pl.BlockSpec((tb, tc), lambda i, j, s: (i, j)),
        ),
        compiler_params=pltpu.CompilerParams(
            dimension_semantics=("parallel", "parallel")),
    )(seed_arr, h, a.reshape(1, C).astype(jnp.float32),
      c.reshape(1, C).astype(jnp.float32))


def gaussian_noise_layer(x, seed, *, mean=0.0, std=0.2, training=True):
    """GaussianNoiseLayer.forward: y = x + N(mean, std) when training, identity otherwise."""
    if not training:
        return x
    orig_shape = x.shape
    c = orig_shape[-1] if x.ndim >= 2 else x.size
    x2 = x.reshape(-1, c)
    ident = jnp.ones((c,), jnp.float32)
    zero = jnp.zeros((c,), jnp.float32)
    y = fused_affine_lrelu_noise(x2, ident, zero, seed, mean=mean, std=std,
                                 slope=0.0, apply_lrelu=False, add_noise=True)
    return y.reshape(orig_shape)


def _bn_scale_shift(h, p, training, eps=1e-5):
    """Fold BatchNorm1d into per-feature scale/shift (training uses batch statistics)."""
    if training:
        # Tiny per-feature reduction left to XLA; folded into the fused kernel below.
        hf = h.astype(jnp.float32)
        mu = jnp.mean(hf, axis=0)
        var = jnp.var(hf, axis=0)
    else:
        mu, var = p["running_mean"], p["running_var"]
    a = p["gamma"] / jnp.sqrt(var + eps)
    return a, p["beta"] - mu * a


def generator_style_forward(params, x, seed=0, *, training=True,
                            use_batchnorm=True, noise=True, use_dropout=False):
    """Forward pass of Generator_style: returns (x_fea, cls_fea)."""
    if use_dropout:
        # TODO(synk): nn.Dropout(p=0.5) not implemented (module default is use_dropout=False).
        raise NotImplementedError("use_dropout=True is not supported")

    def hidden_block(h_in, p, layer_seed):
        h = linear_pallas(h_in, p["w"], p["b"])
        if use_batchnorm:
            a, c = _bn_scale_shift(h, p, training)
        else:
            a = jnp.ones((h.shape[-1],), jnp.float32)
            c = jnp.zeros((h.shape[-1],), jnp.float32)
        return fused_affine_lrelu_noise(
            h, a, c, layer_seed, mean=0.0, std=0.2, slope=0.2,
            apply_lrelu=True, add_noise=(noise and training))

    h = hidden_block(x, params["fc1"], seed)
    h = hidden_block(h, params["fc2"], seed + 1000003)
    x_fea = linear_pallas(h, params["fc3"]["w"], params["fc3"]["b"])
    cls_fea = linear_pallas(x_fea, params["cls"]["w"], params["cls"]["b"])
    return x_fea, cls_fea


def init_generator_style_params(key, in_dim=4096, out_dim=300, cls_out=2,
                                dtype=jnp.float32):
    hid_dim = (in_dim + out_dim) // 2
    keys = jax.random.split(key, 4)

    def linear(k, fan_in, fan_out):
        kw, kb = jax.random.split(k)
        bound = 1.0 / (fan_in ** 0.5)
        return {
            "w": jax.random.uniform(kw, (fan_in, fan_out), dtype, -bound, bound),
            "b": jax.random.uniform(kb, (fan_out,), dtype, -bound, bound),
        }

    def bn(dim):
        return {
            "gamma": jnp.ones((dim,), jnp.float32),
            "beta": jnp.zeros((dim,), jnp.float32),
            "running_mean": jnp.zeros((dim,), jnp.float32),
            "running_var": jnp.ones((dim,), jnp.float32),
        }

    return {
        "fc1": {**linear(keys[0], in_dim, hid_dim), **bn(hid_dim)},
        "fc2": {**linear(keys[1], hid_dim, hid_dim), **bn(hid_dim)},
        "fc3": linear(keys[2], hid_dim, out_dim),
        "cls": linear(keys[3], out_dim, cls_out),
    }


if __name__ == "__main__":
    key = jax.random.PRNGKey(0)
    kx, kp = jax.random.split(key)

    # Small shapes consistent with Generator_style(in_dim, out_dim): hid_dim = 256.
    B, IN_DIM, OUT_DIM = 8, 384, 128
    x = jax.random.normal(kx, (B, IN_DIM), dtype=jnp.float32)
    params = init_generator_style_params(kp, in_dim=IN_DIM, out_dim=OUT_DIM)

    # --- unit check: Pallas linear vs jnp reference ---
    h_ref = x @ params["fc1"]["w"] + params["fc1"]["b"]
    h_ker = linear_pallas(x, params["fc1"]["w"], params["fc1"]["b"])
    assert jnp.allclose(h_ker, h_ref, rtol=5e-2, atol=5e-2)

    # --- unit check: fused affine + LeakyReLU (noise disabled) vs jnp reference ---
    a = jnp.linspace(0.5, 1.5, h_ref.shape[-1], dtype=jnp.float32)
    c = jnp.linspace(-0.2, 0.2, h_ref.shape[-1], dtype=jnp.float32)
    y_ker = fused_affine_lrelu_noise(h_ref, a, c, 0, slope=0.2,
                                     apply_lrelu=True, add_noise=False)
    t = h_ref * a + c
    y_jnp = jnp.where(t >= 0, t, 0.2 * t)
    assert jnp.allclose(y_ker, y_jnp, rtol=1e-3, atol=1e-3)

    # --- unit check: GaussianNoiseLayer statistics, seeding, eval identity ---
    z0 = gaussian_noise_layer(jnp.zeros((256, 512), jnp.float32), seed=7)
    assert abs(float(jnp.mean(z0))) < 0.01
    assert 0.18 < float(jnp.std(z0)) < 0.22
    z1 = gaussian_noise_layer(jnp.zeros((256, 512), jnp.float32), seed=8)
    assert float(jnp.max(jnp.abs(z0 - z1))) > 0.0
    x_eval = gaussian_noise_layer(x, seed=3, training=False)
    assert bool(jnp.all(x_eval == x))

    # --- full Generator_style forward (training mode, noise + batchnorm) ---
    fwd = jax.jit(functools.partial(generator_style_forward, training=True))
    x_fea, cls_fea = fwd(params, x, 1234)
    x_fea, cls_fea = jax.block_until_ready((x_fea, cls_fea))
    assert x_fea.shape == (B, OUT_DIM) and cls_fea.shape == (B, 2)
    assert bool(jnp.all(jnp.isfinite(x_fea))) and bool(jnp.all(jnp.isfinite(cls_fea)))

    # eval mode: no noise, fully deterministic regardless of the seed
    xf1, _ = generator_style_forward(params, x, 1, training=False)
    xf2, _ = generator_style_forward(params, x, 2, training=False)
    assert bool(jnp.all(xf1 == xf2))

    print("KERNEL_OK")
</pallas_src>

<mosaic_0001>
module attributes {stable_mosaic.version = 11 : i64} {
  func.func @_linear_kernel(%arg0: i32, %arg1: i32, %arg2: i32, %arg3: memref<8x128xf32, #tpu.memory_space<vmem>>, %arg4: memref<128x256xf32, #tpu.memory_space<vmem>>, %arg5: memref<1x256xf32, #tpu.memory_space<vmem>>, %arg6: memref<8x256xf32, #tpu.memory_space<vmem>>, %arg7: memref<8x256xf32, #tpu.memory_space<vmem>>) attributes {dimension_semantics = [#tpu.dimension_semantics<parallel>, #tpu.dimension_semantics<parallel>, #tpu.dimension_semantics<arbitrary>], iteration_bounds = array<i64: 1, 1, 3>, scalar_prefetch = 0 : i64, scratch_operands = 1 : i64, tpu.core_type = #tpu.core_type<tc>, window_params = [{transform_indices = @transform_0, window_bounds = array<i64: 8, 128>}, {transform_indices = @transform_1, window_bounds = array<i64: 128, 256>}, {transform_indices = @transform_2, window_bounds = array<i64: 1, 256>}, {transform_indices = @transform_3, window_bounds = array<i64: 8, 256>}]} {
    %c0_i32 = arith.constant 0 : i32
    %0 = arith.cmpi eq, %arg2, %c0_i32 : i32
    %1 = arith.extui %0 : i1 to i32
    %c0_i32_0 = arith.constant 0 : i32
    %2 = arith.cmpi ne, %1, %c0_i32_0 : i32
    scf.if %2 {
      %cst_9 = arith.constant 0.000000e+00 : f32
      %12 = vector.broadcast %cst_9 : f32 to vector<8x256xf32>
      %c0_10 = arith.constant 0 : index
      %c0_11 = arith.constant 0 : index
      %13 = vector.load %arg7[%c0_10, %c0_11] : memref<8x256xf32, #tpu.memory_space<vmem>>, vector<8x256xf32>
      tpu.vector_store %arg7[%c0_10, %c0_11], %12 {strides = array<i32>} : memref<8x256xf32, #tpu.memory_space<vmem>>, vector<8x256xf32>,
    } else {
    }
    %c0 = arith.constant 0 : index
    %c0_1 = arith.constant 0 : index
    %3 = vector.load %arg7[%c0, %c0_1] : memref<8x256xf32, #tpu.memory_space<vmem>>, vector<8x256xf32>
    %c0_2 = arith.constant 0 : index
    %c0_3 = arith.constant 0 : index
    %4 = vector.load %arg3[%c0_2, %c0_3] : memref<8x128xf32, #tpu.memory_space<vmem>>, vector<8x128xf32>
    %c0_4 = arith.constant 0 : index
    %c0_5 = arith.constant 0 : index
    %5 = vector.load %arg4[%c0_4, %c0_5] : memref<128x256xf32, #tpu.memory_space<vmem>>, vector<128x256xf32>
    %cst = arith.constant dense<0.000000e+00> : vector<8x256xf32>
    %6 = tpu.matmul %4, %5, %cst {dimension_numbers = #tpu.dot_dimension_numbers<[1], [0], [0], [1], [0, 0, 1, 1], [], []>} : vector<8x128xf32>, vector<128x256xf32>, vector<8x256xf32> -> vector<8x256xf32>
    %7 = arith.addf %3, %6 : vector<8x256xf32>
    %c0_6 = arith.constant 0 : index
    %c0_7 = arith.constant 0 : index
    %8 = vector.load %arg7[%c0_6, %c0_7] : memref<8x256xf32, #tpu.memory_space<vmem>>, vector<8x256xf32>
    tpu.vector_store %arg7[%c0_6, %c0_7], %7 {strides = array<i32>} : memref<8x256xf32, #tpu.memory_space<vmem>>, vector<8x256xf32>,
    %c2_i32 = arith.constant 2 : i32
    %9 = arith.cmpi eq, %arg2, %c2_i32 : i32
    %10 = arith.extui %9 : i1 to i32
    %c0_i32_8 = arith.constant 0 : i32
    %11 = arith.cmpi ne, %10, %c0_i32_8 : i32
    scf.if %11 {
      %c0_9 = arith.constant 0 : index
      %c0_10 = arith.constant 0 : index
      %12 = vector.load %arg7[%c0_9, %c0_10] : memref<8x256xf32, #tpu.memory_space<vmem>>, vector<8x256xf32>
      %c0_11 = arith.constant 0 : index
      %c0_12 = arith.constant 0 : index
      %13 = vector.load %arg5[%c0_11, %c0_12] : memref<1x256xf32, #tpu.memory_space<vmem>>, vector<1x256xf32>
      %14 = vector.broadcast %13 : vector<1x256xf32> to vector<8x256xf32>
      %15 = arith.addf %12, %14 : vector<8x256xf32>
      %c0_13 = arith.constant 0 : index
      %c0_14 = arith.constant 0 : index
      %16 = vector.load %arg6[%c0_13, %c0_14] : memref<8x256xf32, #tpu.memory_space<vmem>>, vector<8x256xf32>
      tpu.vector_store %arg6[%c0_13, %c0_14], %15 {strides = array<i32>} : memref<8x256xf32, #tpu.memory_space<vmem>>, vector<8x256xf32>,
    } else {
    }
    return
  }
  func.func @transform_0(%arg0: i32, %arg1: i32, %arg2: i32) -> (i32, i32) {
    %c0_i32 = arith.constant 0 : i32
    return %arg0, %arg2 : i32, i32
  }
  func.func @transform_1(%arg0: i32, %arg1: i32, %arg2: i32) -> (i32, i32) {
    %c0_i32 = arith.constant 0 : i32
    return %arg2, %arg1 : i32, i32
  }
  func.func @transform_2(%arg0: i32, %arg1: i32, %arg2: i32) -> (i32, i32) {
    %c0_i32 = arith.constant 0 : i32
    %c0_i32_0 = arith.constant 0 : i32
    return %c0_i32, %arg1 : i32, i32
  }
  func.func @transform_3(%arg0: i32, %arg1: i32, %arg2: i32) -> (i32, i32) {
    %c0_i32 = arith.constant 0 : i32
    return %arg0, %arg1 : i32, i32
  }
}

</mosaic_0001>

<bundles_post_ra>
// kernel: tpu_custom_call.1
= control target key start
LH: loop header
LB: loop body
LE: loop exit
PB: predicated region body
PF: predicated region fallthrough
CT: control target
= control target key end

     0   :  { %8 = vsyncpa [#allocation4], 0  ;;  %s1066_s0 = inlined_call_operand.hbm [shape: f32[8,384], index: 0, kind: input, shape index: {}]   ;;  %s1067_s1 = inlined_call_operand.hbm [shape: f32[384,256], index: 1, kind: input, shape index: {}]   ;;  %s1068_s2 = inlined_call_operand.vmem [shape: f32[1,256], index: 2, kind: input, shape index: {}]   ;;  %s1069_s3 = inlined_call_operand.hbm [shape: f32[8,256], index: 3, kind: output, shape index: {}]  }
   0x1   :  { %10 = vsyncpa [#allocation4 + $0x1], 0 }
   0x2   :  { %11 = vsyncpa [#allocation7], 0 }
   0x3   :  { %13 = vsyncpa [#allocation7 + $0x1], 0 }
   0x4   :  { %14 = vsyncpa [#allocation5], 0  ;;  %s825_s12 = smov 0   ;;  %s827_s13 = smov 0  }
   0x5   :  { %s829_s14 = smov 0   ;;  %s831_s15 = smov 0  }
   0x6   :  { %s833_s16 = smov 0   ;;  %s835_s17 = smov 0  }
   0x7 LB: > { %s528_s18 = sadd.s32 4294967295, %s796_s17   ;;  %s32_s19 = sadd.s32 1, %s792_s16  ;;  %s796_s17 = sphi %s835_s17, %s20_s17   ;;  %s792_s16 = sphi %s833_s16, %s1083_s16   ;;  %s788_s15 = sphi %s831_s15, %s1082_s15   ;;  %s784_s14 = sphi %s829_s14, %s1081_s14   ;;  %s780_s13 = sphi %s827_s13, %s1080_s13   ;;  %s776_s12 = sphi %s825_s12, %s1079_s12  }
   0x8   : > { %p33_p0 = scmp.ge.s32.totalorder %s32_s19, 3  ;;  %s48_s20 = sadd.s32 1, %s784_s14 }
   0x9   : > { %p55_p1 = scmp.ne.s32.totalorder %s784_s14, %s780_s13  ;;  %p56_p2 = scmp.eq.s32.totalorder %s796_s17, 0 }
   0xa   : > { %s1085_s19 = smov (%p33_p0, %s32_s19), 0  ;;  %p61_p4 = scmp.ne.s32.totalorder %s780_s13, %s776_s12 }
   0xb   : > { %p861_p3 = por %p56_p2, %p55_p1  ;;  %s44_s22 = ssub.s32 %s792_s16, %s1085_s19 }
   0xc   : > { %p62_p5 = scmp.eq.s32.totalorder %s528_s18, 0  ;;  %p46_p6 = scmp.eq.s32.totalorder %s44_s22, 0 }
   0xd   : > { %p596_p8 = scmp.lt.s32.totalorder %s796_s17, 3  ;;  %s879_s25 = sand.u32 1, %s784_s14  }
   0xe   : > { %p870_p7 = por %p62_p5, %p61_p4  ;;  %s533_s26 = sshll.u32 %s792_s16, 7 }
   0xf   : > { %s876_s24 = scalar_select %p46_p6, %s784_s14, %s48_s20  }
  0x10   : > { %s1072_s23 = scalar_select %p870_p7, 1, 0 }
  0x11   : > { %s532_s27 = sshll.u32 %s879_s25, 3  ;;  %s886_s30 = scalar_lea.hbm %s1066_s0, %s533_s26 }
  0x12   : > { %s179_s4 = scalar_lea.vmem [#allocation3], %s532_s27  ;;  %p890_p9 = pnand %p596_p8, %p861_p3 }
  0x13   : > { %s188_s5 = sshll.u32 %s179_s4, 4  ;;  %s176_s7 = scalar_lea.sflag [#allocation4], %s879_s25  ;;  %s894_s5 = int_to_ptr.vmem [resolvable:$true] %s188_s5 }
  0x14   : > { %s652_s8 = scalar_lea.hbm %s886_s30, 128  ;;  %p654_p13 = pneg %p890_p9 }
  0x15   : > { %p653_p12 = scmp.ne.s32.totalorder %s886_s30, %s652_s8  ;;  %s657_s11 = scalar_lea.hbm %s1066_s0, 384 }
  0x16   : > { %p658_p2 = scmp.lt.u32.totalorder %s886_s30, %s1066_s0  ;;  %p659_p3 = scmp.lt.u32.totalorder %s657_s11, %s652_s8 }
  0x17   : > { %p655_p0 = pnand %p654_p13, %p653_p12  ;;  %p661_p5 = scmp.lt.u32.totalorder %s652_s8, %s886_s30 }
  0x18   : > { %p660_p4 = por %p659_p3, %p658_p2 }
  0x19   : > { %p656_p1 = pneg %p655_p0 }
  0x1a   : > { %p662_p6 = por %p661_p5, %p660_p4 }
  0x1c   : > { %p663_p8 = pnand %p662_p6, %p656_p1 }
  0x1e   : > { %666 = shalt.err (!%p663_p8)
}
  0x1f   : > { %s667_s21 = scalar_lea.vmem %s894_s5, 128  ;;  %s798_s22 = smov [#allocation3]  }
  0x20   : > { %p668_p12 = scmp.ne.s32.totalorder %s894_s5, %s667_s21  ;;  %s672_s26 = sshll.u32 %s798_s22, 4  ;;  %s673_s26 = int_to_ptr.vmem [resolvable:$false] %s672_s26 }
  0x21   : > { %s674_s27 = scalar_lea.vmem %s673_s26, 256  ;;  %p675_p11 = scmp.lt.s32.totalorder %s894_s5, %s673_s26 }
  0x22   : > { %p670_p0 = pnand %p668_p12, %p654_p13  ;;  %p676_p2 = scmp.lt.s32.totalorder %s674_s27, %s667_s21 }
  0x24   : > { %p671_p10 = pneg %p670_p0  ;;  %p677_p3 = por %p676_p2, %p675_p11 }
  0x26   : > { %p678_p4 = pnand %p677_p3, %p671_p10 }
  0x28   : > { %681 = shalt.err (!%p678_p4)
}
  0x29   : > { %592 = dma.hbm_to_vmem [thread:$0]  (!%p890_p9), %s886_s30, 128, %s894_s5, %s176_s7  }
  0x2a   : > { %p1074_p1 = scmp.lt.s32.totalorder %s796_s17, 4  ;;  %p1075_p5 = scmp.ge.s32.totalorder %s796_s17, 1 }
  0x2b   : > { %s534_s29 = sshll.u32 %s879_s25, 8  ;;  %s548_s4 = sshll.u32 %s792_s16, 12 }
  0x2c   : > { %p928_p6 = pnand %p1075_p5, %p1074_p1  ;;  %s937_s10 = scalar_lea.hbm %s1067_s1, %s548_s4 }
  0x2d   : > { %s199_s11 = scalar_lea.vmem [#allocation6], %s534_s29  ;;  %s196_s30 = scalar_lea.sflag [#allocation7], %s879_s25 }
  0x2e   : > { %s209_s12 = sshll.u32 %s199_s11, 4  ;;  %s682_s5 = scalar_lea.hbm %s937_s10, 4096  ;;  %s939_s12 = int_to_ptr.vmem [resolvable:$true] %s209_s12 }
  0x2f   : > { %p683_p10 = scmp.ne.s32.totalorder %s937_s10, %s682_s5  ;;  %s687_s21 = scalar_lea.hbm %s1067_s1, 12288 }
  0x30   : > { %p688_p12 = scmp.lt.u32.totalorder %s937_s10, %s1067_s1  ;;  %p689_p0 = scmp.lt.u32.totalorder %s687_s21, %s682_s5 }
  0x31   : > { %p685_p11 = pnand %p683_p10, %p654_p13  ;;  %p691_p3 = scmp.lt.u32.totalorder %s682_s5, %s937_s10 }
  0x32   : > { %p690_p2 = por %p689_p0, %p688_p12 }
  0x33   : > { %p686_p8 = pneg %p685_p11 }
  0x34   : > { %p692_p4 = por %p691_p3, %p690_p2 }
  0x36   : > { %p693_p1 = pnand %p692_p4, %p686_p8 }
  0x38   : > { %696 = shalt.err (!%p693_p1)
}
  0x39   : > { %s697_s27 = scalar_lea.vmem %s939_s12, 4096  ;;  %s799_s29 = smov [#allocation6]  }
  0x3a   : > { %p698_p5 = scmp.ne.s32.totalorder %s939_s12, %s697_s27  ;;  %s702_s4 = sshll.u32 %s799_s29, 4  ;;  %s703_s4 = int_to_ptr.vmem [resolvable:$false] %s702_s4 }
  0x3b   : > { %s704_s8 = scalar_lea.vmem %s703_s4, 8192  ;;  %p705_p7 = scmp.lt.s32.totalorder %s939_s12, %s703_s4 }
  0x3c   : > { %p700_p10 = pnand %p698_p5, %p654_p13  ;;  %p706_p12 = scmp.lt.s32.totalorder %s704_s8, %s697_s27 }
  0x3e   : > { %p701_p11 = pneg %p700_p10  ;;  %p707_p0 = por %p706_p12, %p705_p7 }
  0x40   : > { %p708_p2 = pnand %p707_p0, %p701_p11 }
  0x42   : > { %711 = shalt.err (!%p708_p2)
}
  0x43   : > { %s800_s9 = smov 256   ;;  %s801_s11 = smov 16  }
  0x44   : > { %595 = dma.hbm_to_vmem [thread:$0]  (!%p890_p9), %s937_s10, 4096, %s939_s12, %s196_s30, %s800_s9, %s800_s9, %s801_s11  }
  0x45   : > { %221 = sbr.rel (%p928_p6) target bundleno = 375 (0x177), region = 32  ;;  %s223_s5 = sand.u32 (!%p928_p6), 1, %s780_s13  }
  0x46   : > { %s539_s7 = sshll.u32 (!%p928_p6), %s223_s5, 3  ;;  %s224_s20 = scalar_lea.sflag (!%p928_p6), [#allocation4], %s223_s5 }
  0x47   : > { %s970_s21 = scalar_lea.vmem (!%p928_p6), [#allocation3], %s539_s7  ;;  %p1077_p7 = scmp.ne.s32.totalorder (!%p928_p6), %s1072_s23, 0 }
  0x4c   : > { %763 = dma.done.wait (%p1077_p7), %s224_s20, 128  }
  0x4d   : > { %765 = vsyncadd (%p1077_p7), %s224_s20, 4294967168  ;;  %s540_s22 = sshll.u32 %s223_s5, 8  ;;  %s233_s6 = scalar_lea.sflag [#allocation7], %s223_s5 }
  0x4e   : > { %s976_s25 = scalar_lea.vmem [#allocation6], %s540_s22 }
  0x4f   : > { %767 = dma.done.wait (%p1077_p7), %s233_s6, 4096  }
  0x50   : > { %769 = vsyncadd (%p1077_p7), %s233_s6, 4294963200  ;;  %p541_p9 = scmp.ne.s32.totalorder %s788_s15, 0 }
  0x51   : > { %v802_v0 = vmov (!%p541_p9), 0.0  }
  0x52   : > { %274 = sbr.rel (%p541_p9) target bundleno = 89 (0x59), region = 44  ;;  %275 = vst [vmem:[#allocation2] sm:$0xff] (!%p541_p9), %v802_v0  ;;  %276 = vst [vmem:[#allocation2 + $0x8] sm:$0xff] (!%p541_p9), %v802_v0 }
  0x59 PF: > { %v281_v1 = vld [vmem:[%s976_s25 + $0x8] sm:$0xff]  ;;  %v283_v2 = vld [vmem:[%s976_s25 + $0x18] sm:$0xff]  ;;  %v280_v3 = vld [vmem:[%s976_s25] sm:$0xff]  ;;  %v803_v8 = vmov 0.0   ;;  %p542_p13 = scmp.ne.s32.totalorder %s788_s15, 2 }
  0x5a   : > { %v549_v4 = vpack.c.bf16 %v283_v2, %v281_v1  ;;  %v282_v5 = vld [vmem:[%s976_s25 + $0x10] sm:$0xff]  ;;  %v285_v6 = vld [vmem:[%s976_s25 + $0x28] sm:$0xff]  ;;  %v287_v7 = vld [vmem:[%s976_s25 + $0x38] sm:$0xff]  ;;  %376 = vmatprep.mubr.f32.mxu0 %v803_v8  ;;  %v395_v57 = vlaneseq (!%p542_p13) }
  0x5b   : > { %v551_v9 = vpack.c.bf16 %v282_v5, %v280_v3  ;;  %v553_v10 = vpack.c.bf16 %v287_v7, %v285_v6  ;;  %v284_v11 = vld [vmem:[%s976_s25 + $0x20] sm:$0xff]  ;;  %v286_v12 = vld [vmem:[%s976_s25 + $0x30] sm:$0xff]  ;;  %v289_v13 = vld [vmem:[%s976_s25 + $0x48] sm:$0xff] }
  0x5c   : > { %550 = vmatprep.subr.bf16.mxu0 %v549_v4  ;;  %v291_v14 = vld [vmem:[%s976_s25 + $0x58] sm:$0xff]  ;;  %v555_v15 = vpack.c.bf16 %v286_v12, %v284_v11  ;;  %v288_v17 = vld [vmem:[%s976_s25 + $0x40] sm:$0xff]  ;;  %v290_v18 = vld [vmem:[%s976_s25 + $0x50] sm:$0xff]  ;;  %v396_v58 = vshrl.u32 (!%p542_p13), %v395_v57, 7 }
  0x5d   : > { %552 = vmatpush1.bf16.msra.mxu0 %v551_v9  ;;  %v557_v16 = vpack.c.bf16 %v291_v14, %v289_v13  ;;  %v293_v19 = vld [vmem:[%s976_s25 + $0x68] sm:$0xff]  ;;  %v295_v20 = vld [vmem:[%s976_s25 + $0x78] sm:$0xff]  ;;  %v559_v21 = vpack.c.bf16 %v290_v18, %v288_v17  ;;  %v292_v23 = vld [vmem:[%s976_s25 + $0x60] sm:$0xff] }
  0x5e   : > { %554 = vmatprep.subr.bf16.mxu0 %v553_v10  ;;  %v561_v22 = vpack.c.bf16 %v295_v20, %v293_v19  ;;  %v294_v24 = vld [vmem:[%s976_s25 + $0x70] sm:$0xff]  ;;  %v297_v25 = vld [vmem:[%s976_s25 + $0x88] sm:$0xff]  ;;  %v299_v26 = vld [vmem:[%s976_s25 + $0x98] sm:$0xff]  ;;  %v397_v60 = vsub.s32 (!%p542_p13), 0, %v396_v58  ;;  %v401_v61 = vsub.s32 (!%p542_p13), 1, %v396_v58 }
  0x5f   : > { %v563_v27 = vpack.c.bf16 %v294_v24, %v292_v23  ;;  %v565_v28 = vpack.c.bf16 %v299_v26, %v297_v25  ;;  %v296_v29 = vld [vmem:[%s976_s25 + $0x80] sm:$0xff]  ;;  %v298_v30 = vld [vmem:[%s976_s25 + $0x90] sm:$0xff]  ;;  %v301_v31 = vld [vmem:[%s976_s25 + $0xa8] sm:$0xff] }
  0x60   : > { %v303_v32 = vld [vmem:[%s976_s25 + $0xb8] sm:$0xff]  ;;  %v567_v33 = vpack.c.bf16 %v298_v30, %v296_v29  ;;  %v300_v35 = vld [vmem:[%s976_s25 + $0xa0] sm:$0xff]  ;;  %v302_v36 = vld [vmem:[%s976_s25 + $0xb0] sm:$0xff] }
  0x61   : > { %556 = vmatpush1.bf16.msra.mxu0 %v555_v15  ;;  %v569_v34 = vpack.c.bf16 %v303_v32, %v301_v31  ;;  %v305_v37 = vld [vmem:[%s976_s25 + $0xc8] sm:$0xff]  ;;  %v307_v38 = vld [vmem:[%s976_s25 + $0xd8] sm:$0xff]  ;;  %v571_v39 = vpack.c.bf16 %v302_v36, %v300_v35  ;;  %v304_v41 = vld [vmem:[%s976_s25 + $0xc0] sm:$0xff] }
  0x62   : > { %558 = vmatprep.subr.bf16.mxu0 %v557_v16  ;;  %v573_v40 = vpack.c.bf16 %v307_v38, %v305_v37  ;;  %v306_v42 = vld [vmem:[%s976_s25 + $0xd0] sm:$0xff]  ;;  %v309_v43 = vld [vmem:[%s976_s25 + $0xe8] sm:$0xff]  ;;  %v311_v44 = vld [vmem:[%s976_s25 + $0xf8] sm:$0xff] }
  0x63   : > { %v575_v45 = vpack.c.bf16 %v306_v42, %v304_v41  ;;  %v577_v46 = vpack.c.bf16 %v311_v44, %v309_v43  ;;  %v308_v47 = vld [vmem:[%s976_s25 + $0xe0] sm:$0xff]  ;;  %v310_v48 = vld [vmem:[%s976_s25 + $0xf0] sm:$0xff]  ;;  %v278_v52 = vld [vmem:[#allocation2 + $0x8] sm:$0xff] }
  0x64   : > { %v579_v49 = vpack.c.bf16 %v310_v48, %v308_v47  ;;  %v279_v50 = vld [vmem:[%s970_s21] sm:$0xff]  ;;  %v277_v51 = vld [vmem:[#allocation2] sm:$0xff] }
  0x65   : > { %560 = vmatpush1.bf16.msra.mxu0 %v559_v21  ;;  %v393_v59 = vld [vmem:[%s1068_s2] sm:$0x3] (!%p542_p13) }
  0x66   : > { %562 = vmatprep.subr.bf16.mxu0 %v561_v22  ;;  %v398_v0 = vrot.slane (!%p542_p13), %v393_v59, %v397_v60  ;;  %v402_v1 = vrot.slane (!%p542_p13), %v393_v59, %v401_v61 }
  0x69   : > { %564 = vmatpush1.bf16.msra.mxu0 %v563_v27 }
  0x6a   : > { %566 = vmatprep.subr.bf16.mxu0 %v565_v28 }
  0x6d   : > { %568 = vmatpush1.bf16.msra.mxu0 %v567_v33 }
  0x6e   : > { %570 = vmatprep.subr.bf16.mxu0 %v569_v34 }
  0x71   : > { %572 = vmatpush1.bf16.msra.mxu0 %v571_v39 }
  0x72   : > { %574 = vmatprep.subr.bf16.mxu0 %v573_v40 }
  0x75   : > { %576 = vmatpush1.bf16.msra.mxu0 %v575_v45 }
  0x76   : > { %578 = vmatprep.subr.bf16.mxu0 %v577_v46 }
  0x79   : > { %580 = vmatpush1.bf16.msra.mxu0 %v579_v49 }
  0x7c   : > { %377 = vmatmul.mubr.f32.vlgmr.msra.gmra.mrb[0].mxu0 %v279_v50 }
 0x14d   : > { %390 = sbr.rel (%p542_p13) target bundleno = 350 (0x15e), region = 48 }
 0x14f   : > { %v378_v53 = vpop.f32.mrb[0].mxu0 }
 0x150   : > { %v383_v54 = vadd.f32 %v378_v53, %v277_v51  ;;  %v380_v55 = vpop.f32.mrb[1].mxu0 }
 0x151   : > { %v384_v56 = vadd.f32 %v380_v55, %v278_v52 }
 0x152   : > { %385 = vst [vmem:[#allocation2] sm:$0xff] %v383_v54 }
 0x153   : > { %386 = vst [vmem:[#allocation2 + $0x8] sm:$0xff] %v384_v56 }
 0x159   : > { %v391_v62 = vld [vmem:[#allocation2] sm:$0xff] }
 0x15a   : > { %v392_v63 = vld [vmem:[#allocation2 + $0x8] sm:$0xff]  ;;  %v405_v2 = vadd.f32 %v398_v0, %v391_v62 }
 0x15b   : > { %v406_v3 = vadd.f32 %v402_v1, %v392_v63 }
 0x15c   : > { %407 = vst [vmem:[#allocation8] sm:$0xff] %v405_v2 }
 0x15d   : > { %408 = vst [vmem:[#allocation8 + $0x8] sm:$0xff] %v406_v3 }
 0x15e PF: > { %p1022_p6 = scmp.eq.s32.totalorder %s528_s18, 2  ;;  %s804_s10 = smov [#allocation8]  }
 0x15f   : > { %s421_s12 = sshll.u32 %s804_s10, 4  ;;  %s422_s12 = int_to_ptr.vmem [resolvable:$true] %s421_s12 }
 0x160   : > { %s712_s30 = scalar_lea.vmem %s422_s12, 256  ;;  %p719_p1 = scmp.lt.s32.totalorder %s422_s12, %s422_s12 }
 0x161   : > { %p713_p8 = scmp.ne.s32.totalorder %s422_s12, %s712_s30  ;;  %p720_p5 = scmp.lt.s32.totalorder %s712_s30, %s712_s30 }
 0x163   : > { %p714_p3 = pnand %p713_p8, %p1022_p6  ;;  %p721_p10 = por %p720_p5, %p719_p1 }
 0x165   : > { %p715_p4 = pneg %p714_p3 }
 0x167   : > { %p722_p11 = pnand %p721_p10, %p715_p4 }
 0x169   : > { %725 = shalt.err (!%p722_p11)
}
 0x16a   : > { %s726_s18 = scalar_lea.hbm %s1069_s3, 256 }
 0x16b   : > { %p727_p12 = scmp.ne.s32.totalorder %s1069_s3, %s726_s18  ;;  %p732_p7 = scmp.lt.u32.totalorder %s726_s18, %s1069_s3 }
 0x16d   : > { %p728_p0 = pnand %p727_p12, %p1022_p6 }
 0x16f   : > { %p729_p2 = pneg %p728_p0 }
 0x171   : > { %p734_p9 = pnand %p732_p7, %p729_p2 }
 0x173   : > { %737 = shalt.err (!%p734_p9)
}
 0x174   : > { %586 = dma.vmem_to_hbm [thread:$0]  (%p1022_p6), %s422_s12, 256, %s1069_s3, [#allocation5]  }
 0x175   : > { %771 = dma.done.wait (%p1022_p6), [#allocation5], 256  }
 0x176   : > { %773 = vsyncadd (%p1022_p6), [#allocation5], 4294967040 }
 0x177 PF: > { %s20_s17 = sadd.s32 1, %s796_s17   ;;  %s1079_s12 = smov %s780_s13 }
 0x178   : > { %p17_p13 = scmp.ge.s32.totalorder %s20_s17, 5   ;;  %s1080_s13 = smov %s784_s14 }
 0x179   : > { %s1081_s14 = smov %s876_s24  ;;  %s1082_s15 = smov %s792_s16 }
 0x17a   : > { %s1083_s16 = smov %s1085_s19  ;;  %19 = sbr.rel (!%p17_p13) target bundleno = 7 (0x7), region = 94 }
 0x181   :  { %434 = vsyncpa [#allocation4], 1 }
 0x182   :  { %436 = vsyncpa [#allocation4 + $0x1], 1 }
 0x183   :  { %437 = vsyncpa [#allocation7], 1 }
 0x184   :  { %439 = vsyncpa [#allocation7 + $0x1], 1 }
 0x185   :  { %440 = vsyncpa [#allocation5], 1 }
 0x186   :  { %442 = vsyncpa [#allocation5 + $0x1], 1 }

</bundles_post_ra>
